<compile_context>
chip_gen: v7x
topology: tpu7x:2x2x1
jax: 0.10.0
libtpu: 0.0.40
codegen_flags: <defaults>
</compile_context>

<pallas_src>
import jax
import jax.numpy as jnp
from jax.experimental import pallas as pl
from jax.experimental.pallas import tpu as pltpu

INPUT_DIM = 1260            # logical feature dim of obs_flat
PADDED_INPUT_DIM = 1280     # 10 * 128, lane/MXU aligned (weights padded once)
PAD = PADDED_INPUT_DIM - INPUT_DIM
DIM = 128
LN_EPS = 1e-5
MAX_TB = 1024               # batch tile cap

# Rows of the packed (8, 128) parameter-vector array.
_ROW_B1, _ROW_G1, _ROW_BE1, _ROW_B2, _ROW_G2, _ROW_BE2 = 0, 1, 2, 3, 4, 5


def _layernorm_tanh(h, gamma, beta):
    """LayerNorm over last dim (biased variance, eps=1e-5) followed by tanh, f32."""
    mean = jnp.mean(h, axis=-1, keepdims=True)
    centered = h - mean
    var = jnp.mean(centered * centered, axis=-1, keepdims=True)
    inv = jax.lax.rsqrt(var + LN_EPS)
    return jnp.tanh(centered * inv * gamma + beta)


def encoder_kernel(
    x_ref,      # (TB, INPUT_DIM)          f32   -- streamed per grid step
    w1_ref,     # (PADDED_INPUT_DIM, DIM)  bf16  -- resident across grid
    w2_ref,     # (DIM, DIM)               bf16  -- resident across grid
    vec_ref,    # (8, DIM)                 f32   -- packed b1/g1/be1/b2/g2/be2
    o_ref,      # (TB, DIM)                f32
    xpad_ref,   # (TB, PADDED_INPUT_DIM)   bf16  -- VMEM scratch
):
    vec = vec_ref[...]                       # one vreg
    b1 = vec[_ROW_B1:_ROW_B1 + 1]
    g1 = vec[_ROW_G1:_ROW_G1 + 1]
    be1 = vec[_ROW_BE1:_ROW_BE1 + 1]
    b2 = vec[_ROW_B2:_ROW_B2 + 1]
    g2 = vec[_ROW_G2:_ROW_G2 + 1]
    be2 = vec[_ROW_BE2:_ROW_BE2 + 1]

    tb = x_ref.shape[0]

    # Build the K-padded bf16 activation tile in VMEM scratch.  The 20-lane
    # tail is re-zeroed every step (cheap masked store) instead of only on
    # program_id==0, so it stays correct when the parallel grid axis is split
    # across TensorCores (each core has its own scratch copy).
    xpad_ref[:, INPUT_DIM:] = jnp.zeros((tb, PAD), dtype=jnp.bfloat16)
    xpad_ref[:, :INPUT_DIM] = x_ref[...].astype(jnp.bfloat16)

    # Layer 1: Linear (bf16 MXU, f32 acc) -> LayerNorm -> Tanh (f32 VPU/EUP).
    h = jnp.dot(xpad_ref[...], w1_ref[...],
                preferred_element_type=jnp.float32) + b1
    h = _layernorm_tanh(h, g1, be1)

    # Layer 2: Linear -> LayerNorm -> Tanh.
    h = jnp.dot(h.astype(jnp.bfloat16), w2_ref[...],
                preferred_element_type=jnp.float32) + b2
    h = _layernorm_tanh(h, g2, be2)

    o_ref[...] = h.astype(o_ref.dtype)


def _pick_tb(batch: int) -> int:
    """Batch tile: >=2 even-count grid steps when possible, TB % 8 == 0 (or ==B)."""
    if batch <= 8:
        return batch                      # single full-batch block (== full dim)
    steps = max(2, -(-batch // MAX_TB))   # ceil-div
    if steps % 2:
        steps += 1                        # even #steps -> both v7x TCs get work
    tb = -(-batch // steps)
    tb = ((tb + 7) // 8) * 8              # multiple of 8 sublanes
    return min(tb, MAX_TB)


@jax.jit
def encoder_forward(x, w1, w2, vec):
    """x: (B, 1260) float32 obs_flat -> (B, 128) float32."""
    B = x.shape[0]
    TB = _pick_tb(B)
    grid = (pl.cdiv(B, TB),)

    cost = pl.CostEstimate(
        flops=2 * B * PADDED_INPUT_DIM * DIM + 2 * B * DIM * DIM,
        transcendentals=2 * B * DIM + 2 * B,
        bytes_accessed=(B * INPUT_DIM * 4            # x (f32, streamed)
                        + PADDED_INPUT_DIM * DIM * 2  # w1 (bf16)
                        + DIM * DIM * 2               # w2 (bf16)
                        + 8 * DIM * 4                 # packed vectors
                        + B * DIM * 4),               # out (f32)
    )

    return pl.pallas_call(
        encoder_kernel,
        out_shape=jax.ShapeDtypeStruct((B, DIM), jnp.float32),
        grid_spec=pltpu.PrefetchScalarGridSpec(
            num_scalar_prefetch=0,
            grid=grid,
            in_specs=[
                # last dim == full array dim (1260) -> legal without 128 multiple
                pl.BlockSpec((TB, INPUT_DIM), lambda i: (i, 0)),
                pl.BlockSpec((PADDED_INPUT_DIM, DIM), lambda i: (0, 0)),
                pl.BlockSpec((DIM, DIM), lambda i: (0, 0)),
                pl.BlockSpec((8, DIM), lambda i: (0, 0)),
            ],
            out_specs=pl.BlockSpec((TB, DIM), lambda i: (i, 0)),
            scratch_shapes=[pltpu.VMEM((TB, PADDED_INPUT_DIM), jnp.bfloat16)],
        ),
        compiler_params=pltpu.CompilerParams(
            dimension_semantics=("parallel",),
            vmem_limit_bytes=40 * 1024 * 1024,
        ),
        cost_estimate=cost,
    )(x, w1, w2, vec)


def normc_init(key, out_features, in_features, std=1.0):
    """normc_initializer: normal(0,1) rows scaled to norm `std` over input dim.

    PyTorch weight is (out, in); returns transposed (in, out) f32 for x @ W.
    """
    w = jax.random.normal(key, (out_features, in_features), dtype=jnp.float32)
    w = w * (std / jnp.sqrt(jnp.sum(w * w, axis=1, keepdims=True)))
    return w.T  # (in, out)


def make_params(key):
    k1, k2 = jax.random.split(key)
    w1_f32 = normc_init(k1, DIM, INPUT_DIM)               # (1260, 128)
    w2_f32 = normc_init(k2, DIM, DIM)                     # (128, 128)

    # Zero-pad w1 rows 1260 -> 1280 once (matches the in-kernel zero-padded x).
    w1_pad = jnp.pad(w1_f32, ((0, PAD), (0, 0)))

    # Packed (8, 128) f32 vector block: b1, ln1_w, ln1_b, b2, ln2_w, ln2_b, 0, 0
    vec = jnp.zeros((8, DIM), jnp.float32)
    vec = vec.at[_ROW_G1].set(1.0)   # ln1 weight = ones
    vec = vec.at[_ROW_G2].set(1.0)   # ln2 weight = ones
    # b1, ln1_b, b2, ln2_b are zeros (rows already zero).

    return {
        "w1": w1_pad.astype(jnp.bfloat16),                # (1280, 128) bf16
        "w2": w2_f32.astype(jnp.bfloat16),                # (128, 128) bf16
        "vec": vec,                                        # (8, 128) f32
        # f32 originals kept for the pure-JAX reference checks
        "_w1_f32": w1_f32,
        "_w2_f32": w2_f32,
    }


def encoder_ref_f32(x, w1_f32, w2_f32, vec):
    """Pure-JAX f32 reference matching the PyTorch forward bit-for-bit math."""
    h = x @ w1_f32 + vec[_ROW_B1]
    h = _layernorm_tanh(h, vec[_ROW_G1], vec[_ROW_BE1])
    h = h @ w2_f32 + vec[_ROW_B2]
    h = _layernorm_tanh(h, vec[_ROW_G2], vec[_ROW_BE2])
    return h


def encoder_ref_matched(x, w1_pad_bf16, w2_bf16, vec):
    """Reference with the same numerics as the kernel (bf16 MXU inputs, f32 acc)."""
    xpad = jnp.pad(x, ((0, 0), (0, PAD))).astype(jnp.bfloat16)
    h = jnp.dot(xpad, w1_pad_bf16, preferred_element_type=jnp.float32) + vec[_ROW_B1]
    h = _layernorm_tanh(h, vec[_ROW_G1], vec[_ROW_BE1])
    h = jnp.dot(h.astype(jnp.bfloat16), w2_bf16,
                preferred_element_type=jnp.float32) + vec[_ROW_B2]
    h = _layernorm_tanh(h, vec[_ROW_G2], vec[_ROW_BE2])
    return h


if __name__ == "__main__":
    key = jax.random.PRNGKey(0)
    kp, kx1, kx2 = jax.random.split(key, 3)
    params = make_params(kp)

    # Case 1: small batch, single grid step.
    batch = 8
    x = jax.random.normal(kx1, (batch, INPUT_DIM), dtype=jnp.float32)  # obs_flat
    out = jax.block_until_ready(
        encoder_forward(x, params["w1"], params["w2"], params["vec"]))
    assert out.shape == (batch, DIM)

    ref_same = encoder_ref_matched(x, params["w1"], params["w2"], params["vec"])
    err_same = float(jnp.max(jnp.abs(out - ref_same)))
    assert err_same < 5e-3, f"mismatch vs matched-precision ref: {err_same}"

    ref_f32 = encoder_ref_f32(x, params["_w1_f32"], params["_w2_f32"], params["vec"])
    err_f32 = float(jnp.max(jnp.abs(out - ref_f32)))
    # bf16 MXU inputs over two layers vs the f32 PyTorch math -> loose tolerance.
    assert err_f32 < 1.5e-1, f"mismatch vs f32 reference: {err_f32}"

    # Case 2: exercises a 2-step grid with a partial (masked-writeback) last block.
    batch2 = 20
    x2 = jax.random.normal(kx2, (batch2, INPUT_DIM), dtype=jnp.float32)
    out2 = jax.block_until_ready(
        encoder_forward(x2, params["w1"], params["w2"], params["vec"]))
    assert out2.shape == (batch2, DIM)
    ref2 = encoder_ref_matched(x2, params["w1"], params["w2"], params["vec"])
    err2 = float(jnp.max(jnp.abs(out2 - ref2)))
    assert err2 < 5e-3, f"multi-step grid mismatch vs matched-precision ref: {err2}"

    print("KERNEL_OK")
</pallas_src>

<mosaic_0001>
module attributes {stable_mosaic.version = 11 : i64} {
  func.func @encoder_kernel(%arg0: i32, %arg1: memref<8x1260xf32, #tpu.memory_space<vmem>>, %arg2: memref<1280x128xbf16, #tpu.memory_space<vmem>>, %arg3: memref<128x128xbf16, #tpu.memory_space<vmem>>, %arg4: memref<8x128xf32, #tpu.memory_space<vmem>>, %arg5: memref<8x128xf32, #tpu.memory_space<vmem>>, %arg6: memref<8x1280xbf16, #tpu.memory_space<vmem>>) attributes {dimension_semantics = [#tpu.dimension_semantics<parallel>], iteration_bounds = array<i64: 1>, scalar_prefetch = 0 : i64, scratch_operands = 1 : i64, tpu.core_type = #tpu.core_type<tc>, window_params = [{transform_indices = @transform_0, window_bounds = array<i64: 8, 1260>}, {pipeline_mode = #tpu.pipeline_mode<synchronous>, transform_indices = @transform_1, window_bounds = array<i64: 1280, 128>}, {pipeline_mode = #tpu.pipeline_mode<synchronous>, transform_indices = @transform_2, window_bounds = array<i64: 128, 128>}, {pipeline_mode = #tpu.pipeline_mode<synchronous>, transform_indices = @transform_3, window_bounds = array<i64: 8, 128>}, {transform_indices = @transform_4, window_bounds = array<i64: 8, 128>}]} {
    %c0 = arith.constant 0 : index
    %c0_0 = arith.constant 0 : index
    %0 = vector.load %arg4[%c0, %c0_0] : memref<8x128xf32, #tpu.memory_space<vmem>>, vector<8x128xf32>
    %1 = vector.extract_strided_slice %0 {offsets = [0, 0], sizes = [1, 128], strides = [1, 1]} : vector<8x128xf32> to vector<1x128xf32>
    %2 = vector.extract_strided_slice %0 {offsets = [1, 0], sizes = [1, 128], strides = [1, 1]} : vector<8x128xf32> to vector<1x128xf32>
    %3 = vector.extract_strided_slice %0 {offsets = [2, 0], sizes = [1, 128], strides = [1, 1]} : vector<8x128xf32> to vector<1x128xf32>
    %4 = vector.extract_strided_slice %0 {offsets = [3, 0], sizes = [1, 128], strides = [1, 1]} : vector<8x128xf32> to vector<1x128xf32>
    %5 = vector.extract_strided_slice %0 {offsets = [4, 0], sizes = [1, 128], strides = [1, 1]} : vector<8x128xf32> to vector<1x128xf32>
    %6 = vector.extract_strided_slice %0 {offsets = [5, 0], sizes = [1, 128], strides = [1, 1]} : vector<8x128xf32> to vector<1x128xf32>
    %cst = arith.constant 0.000000e+00 : bf16
    %7 = vector.broadcast %cst : bf16 to vector<8x20xbf16>
    %c0_1 = arith.constant 0 : index
    %c1260 = arith.constant 1260 : index
    %8 = vector.load %arg6[%c0_1, %c1260] : memref<8x1280xbf16, #tpu.memory_space<vmem>>, vector<8x20xbf16>
    tpu.vector_store %arg6[%c0_1, %c1260], %7 {strides = array<i32>} : memref<8x1280xbf16, #tpu.memory_space<vmem>>, vector<8x20xbf16>,
    %c0_2 = arith.constant 0 : index
    %c0_3 = arith.constant 0 : index
    %9 = vector.load %arg1[%c0_2, %c0_3] : memref<8x1260xf32, #tpu.memory_space<vmem>>, vector<8x1260xf32>
    %10 = arith.truncf %9 : vector<8x1260xf32> to vector<8x1260xbf16>
    %c0_4 = arith.constant 0 : index
    %c0_5 = arith.constant 0 : index
    %11 = vector.load %arg6[%c0_4, %c0_5] : memref<8x1280xbf16, #tpu.memory_space<vmem>>, vector<8x1260xbf16>
    tpu.vector_store %arg6[%c0_4, %c0_5], %10 {strides = array<i32>} : memref<8x1280xbf16, #tpu.memory_space<vmem>>, vector<8x1260xbf16>,
    %c0_6 = arith.constant 0 : index
    %c0_7 = arith.constant 0 : index
    %12 = vector.load %arg6[%c0_6, %c0_7] : memref<8x1280xbf16, #tpu.memory_space<vmem>>, vector<8x1280xbf16>
    %c0_8 = arith.constant 0 : index
    %c0_9 = arith.constant 0 : index
    %13 = vector.load %arg2[%c0_8, %c0_9] : memref<1280x128xbf16, #tpu.memory_space<vmem>>, vector<1280x128xbf16>
    %cst_10 = arith.constant dense<0.000000e+00> : vector<8x128xf32>
    %14 = tpu.matmul %12, %13, %cst_10 {dimension_numbers = #tpu.dot_dimension_numbers<[1], [0], [0], [1], [0, 0, 1, 1], [], []>} : vector<8x1280xbf16>, vector<1280x128xbf16>, vector<8x128xf32> -> vector<8x128xf32>
    %15 = vector.broadcast %1 : vector<1x128xf32> to vector<8x128xf32>
    %16 = arith.addf %14, %15 : vector<8x128xf32>
    %cst_11 = arith.constant dense<0.000000e+00> : vector<8xf32>
    %17 = vector.multi_reduction <add>, %16, %cst_11 [1] : vector<8x128xf32> to vector<8xf32>
    %18 = vector.shape_cast %17 : vector<8xf32> to vector<8x1xf32>
    %cst_12 = arith.constant 1.280000e+02 : f32
    %19 = vector.broadcast %cst_12 : f32 to vector<8x1xf32>
    %20 = arith.divf %18, %19 : vector<8x1xf32>
    %21 = vector.broadcast %20 : vector<8x1xf32> to vector<8x128xf32>
    %22 = arith.subf %16, %21 : vector<8x128xf32>
    %23 = arith.mulf %22, %22 : vector<8x128xf32>
    %cst_13 = arith.constant dense<0.000000e+00> : vector<8xf32>
    %24 = vector.multi_reduction <add>, %23, %cst_13 [1] : vector<8x128xf32> to vector<8xf32>
    %25 = vector.shape_cast %24 : vector<8xf32> to vector<8x1xf32>
    %cst_14 = arith.constant 1.280000e+02 : f32
    %26 = vector.broadcast %cst_14 : f32 to vector<8x1xf32>
    %27 = arith.divf %25, %26 : vector<8x1xf32>
    %cst_15 = arith.constant 9.99999974E-6 : f32
    %28 = vector.broadcast %cst_15 : f32 to vector<8x1xf32>
    %29 = arith.addf %27, %28 : vector<8x1xf32>
    %30 = math.rsqrt %29 : vector<8x1xf32>
    %31 = vector.broadcast %30 : vector<8x1xf32> to vector<8x128xf32>
    %32 = arith.mulf %22, %31 : vector<8x128xf32>
    %33 = vector.broadcast %2 : vector<1x128xf32> to vector<8x128xf32>
    %34 = arith.mulf %32, %33 : vector<8x128xf32>
    %35 = vector.broadcast %3 : vector<1x128xf32> to vector<8x128xf32>
    %36 = arith.addf %34, %35 : vector<8x128xf32>
    %37 = math.tanh %36 : vector<8x128xf32>
    %38 = arith.truncf %37 : vector<8x128xf32> to vector<8x128xbf16>
    %c0_16 = arith.constant 0 : index
    %c0_17 = arith.constant 0 : index
    %39 = vector.load %arg3[%c0_16, %c0_17] : memref<128x128xbf16, #tpu.memory_space<vmem>>, vector<128x128xbf16>
    %cst_18 = arith.constant dense<0.000000e+00> : vector<8x128xf32>
    %40 = tpu.matmul %38, %39, %cst_18 {dimension_numbers = #tpu.dot_dimension_numbers<[1], [0], [0], [1], [0, 0, 1, 1], [], []>} : vector<8x128xbf16>, vector<128x128xbf16>, vector<8x128xf32> -> vector<8x128xf32>
    %41 = vector.broadcast %4 : vector<1x128xf32> to vector<8x128xf32>
    %42 = arith.addf %40, %41 : vector<8x128xf32>
    %cst_19 = arith.constant dense<0.000000e+00> : vector<8xf32>
    %43 = vector.multi_reduction <add>, %42, %cst_19 [1] : vector<8x128xf32> to vector<8xf32>
    %44 = vector.shape_cast %43 : vector<8xf32> to vector<8x1xf32>
    %cst_20 = arith.constant 1.280000e+02 : f32
    %45 = vector.broadcast %cst_20 : f32 to vector<8x1xf32>
    %46 = arith.divf %44, %45 : vector<8x1xf32>
    %47 = vector.broadcast %46 : vector<8x1xf32> to vector<8x128xf32>
    %48 = arith.subf %42, %47 : vector<8x128xf32>
    %49 = arith.mulf %48, %48 : vector<8x128xf32>
    %cst_21 = arith.constant dense<0.000000e+00> : vector<8xf32>
    %50 = vector.multi_reduction <add>, %49, %cst_21 [1] : vector<8x128xf32> to vector<8xf32>
    %51 = vector.shape_cast %50 : vector<8xf32> to vector<8x1xf32>
    %cst_22 = arith.constant 1.280000e+02 : f32
    %52 = vector.broadcast %cst_22 : f32 to vector<8x1xf32>
    %53 = arith.divf %51, %52 : vector<8x1xf32>
    %cst_23 = arith.constant 9.99999974E-6 : f32
    %54 = vector.broadcast %cst_23 : f32 to vector<8x1xf32>
    %55 = arith.addf %53, %54 : vector<8x1xf32>
    %56 = math.rsqrt %55 : vector<8x1xf32>
    %57 = vector.broadcast %56 : vector<8x1xf32> to vector<8x128xf32>
    %58 = arith.mulf %48, %57 : vector<8x128xf32>
    %59 = vector.broadcast %5 : vector<1x128xf32> to vector<8x128xf32>
    %60 = arith.mulf %58, %59 : vector<8x128xf32>
    %61 = vector.broadcast %6 : vector<1x128xf32> to vector<8x128xf32>
    %62 = arith.addf %60, %61 : vector<8x128xf32>
    %63 = math.tanh %62 : vector<8x128xf32>
    %c0_24 = arith.constant 0 : index
    %c0_25 = arith.constant 0 : index
    %64 = vector.load %arg5[%c0_24, %c0_25] : memref<8x128xf32, #tpu.memory_space<vmem>>, vector<8x128xf32>
    tpu.vector_store %arg5[%c0_24, %c0_25], %63 {strides = array<i32>} : memref<8x128xf32, #tpu.memory_space<vmem>>, vector<8x128xf32>,
    return
  }
  func.func @transform_0(%arg0: i32) -> (i32, i32) {
    %c0_i32 = arith.constant 0 : i32
    %c0_i32_0 = arith.constant 0 : i32
    return %arg0, %c0_i32 : i32, i32
  }
  func.func @transform_1(%arg0: i32) -> (i32, i32) {
    %c0_i32 = arith.constant 0 : i32
    %c0_i32_0 = arith.constant 0 : i32
    %c0_i32_1 = arith.constant 0 : i32
    return %c0_i32, %c0_i32_0 : i32, i32
  }
  func.func @transform_2(%arg0: i32) -> (i32, i32) {
    %c0_i32 = arith.constant 0 : i32
    %c0_i32_0 = arith.constant 0 : i32
    %c0_i32_1 = arith.constant 0 : i32
    return %c0_i32, %c0_i32_0 : i32, i32
  }
  func.func @transform_3(%arg0: i32) -> (i32, i32) {
    %c0_i32 = arith.constant 0 : i32
    %c0_i32_0 = arith.constant 0 : i32
    %c0_i32_1 = arith.constant 0 : i32
    return %c0_i32, %c0_i32_0 : i32, i32
  }
  func.func @transform_4(%arg0: i32) -> (i32, i32) {
    %c0_i32 = arith.constant 0 : i32
    %c0_i32_0 = arith.constant 0 : i32
    return %arg0, %c0_i32 : i32, i32
  }
}

</mosaic_0001>

<bundles_post_ra>
// kernel: encoder_forward.1
= control target key start
LH: loop header
LB: loop body
LE: loop exit
PB: predicated region body
PF: predicated region fallthrough
CT: control target
= control target key end

     0   :  { %9 = vsyncpa [#allocation4], 0  ;;  %s1737_s0 = inlined_call_operand.hbm [shape: f32[8,1260], index: 0, kind: input, shape index: {}]   ;;  %s1738_s1 = inlined_call_operand.hbm [shape: bf16[1280,128], index: 1, kind: input, shape index: {}]   ;;  %s1739_s2 = inlined_call_operand.hbm [shape: bf16[128,128], index: 2, kind: input, shape index: {}]   ;;  %s1740_s3 = inlined_call_operand.vmem [shape: f32[8,128], index: 3, kind: input, shape index: {}]   ;;  %s1741_s4 = inlined_call_operand.hbm [shape: f32[8,128], index: 4, kind: output, shape index: {}]  }
   0x1   :  { %10 = vsyncpa [#allocation7], 0 }
   0x2   :  { %11 = vsyncpa [#allocation5], 0  ;;  %s1630_s15 = smov [#allocation6]   ;;  %s1536_s19 = scalar_lea.hbm %s1738_s1, 10240 }
   0x3   :  { %s27_s16 = sshll.u32 %s1630_s15, 4  ;;  %p1537_p0 = scmp.ne.s32.totalorder %s1738_s1, %s1536_s19  ;;  %s28_s16 = int_to_ptr.vmem [resolvable:$true] %s27_s16 }
   0x4   :  { %p1540_p1 = scmp.lt.u32.totalorder %s1536_s19, %s1738_s1 }
   0x6   :  { %p1542_p2 = pnand %p1540_p1, %p1537_p0 }
   0x8   :  { %1545 = shalt.err (!%p1542_p2)
}
   0x9   :  { %s1546_s24 = scalar_lea.vmem %s28_s16, 10240  ;;  %p1551_p4 = scmp.lt.s32.totalorder %s28_s16, %s28_s16 }
   0xa   :  { %p1547_p3 = scmp.ne.s32.totalorder %s28_s16, %s1546_s24  ;;  %p1552_p5 = scmp.lt.s32.totalorder %s1546_s24, %s1546_s24 }
   0xc   :  { %p1553_p6 = por %p1552_p5, %p1551_p4 }
   0xe   :  { %p1554_p7 = pnand %p1553_p6, %p1547_p3 }
  0x10   :  { %1557 = shalt.err (!%p1554_p7)
}
  0x11   :  { %s1631_s25 = smov 64   ;;  %s1632_s26 = smov 4  }
  0x12   :  { %33 = dma.hbm_to_vmem [thread:$0]  %s1738_s1, 10240, %s28_s16, [#allocation7], %s1631_s25, %s1631_s25, %s1632_s26  }
  0x13   :  { %s1633_s29 = smov [#allocation3]   ;;  %s1634_s5 = smov [#allocation8]  }
  0x14   :  { %s18_s30 = sshll.u32 %s1633_s29, 4  ;;  %s39_s6 = sshll.u32 %s1634_s5, 4  ;;  %s19_s30 = int_to_ptr.vmem [resolvable:$true] %s18_s30  ;;  %s40_s6 = int_to_ptr.vmem [resolvable:$true] %s39_s6 }
  0x15   :  { %s1558_s9 = scalar_lea.hbm %s1737_s0, 1280 }
  0x16   :  { %p1559_p8 = scmp.ne.s32.totalorder %s1737_s0, %s1558_s9  ;;  %p1562_p9 = scmp.lt.u32.totalorder %s1558_s9, %s1737_s0 }
  0x18   :  { %p1564_p10 = pnand %p1562_p9, %p1559_p8 }
  0x1a   :  { %1567 = shalt.err (!%p1564_p10)
}
  0x1b   :  { %s1568_s1 = scalar_lea.vmem %s19_s30, 1280  ;;  %p1573_p12 = scmp.lt.s32.totalorder %s19_s30, %s19_s30 }
  0x1c   :  { %p1569_p11 = scmp.ne.s32.totalorder %s19_s30, %s1568_s1  ;;  %p1574_p13 = scmp.lt.s32.totalorder %s1568_s1, %s1568_s1 }
  0x1e   :  { %p1575_p0 = por %p1574_p13, %p1573_p12 }
  0x20   :  { %p1576_p1 = pnand %p1575_p0, %p1569_p11 }
  0x22   :  { %1579 = shalt.err (!%p1576_p1)
}
  0x23   :  { %21 = dma.hbm_to_vmem [thread:$0]  %s1737_s0, 1280, %s19_s30, [#allocation4]  }
  0x24   :  { %s1580_s18 = scalar_lea.hbm %s1739_s2, 1024 }
  0x25   :  { %p1581_p2 = scmp.ne.s32.totalorder %s1739_s2, %s1580_s18  ;;  %p1584_p3 = scmp.lt.u32.totalorder %s1580_s18, %s1739_s2 }
  0x27   :  { %p1586_p4 = pnand %p1584_p3, %p1581_p2 }
  0x29   :  { %1589 = shalt.err (!%p1586_p4)
}
  0x2a   :  { %s1590_s23 = scalar_lea.vmem %s40_s6, 1024  ;;  %p1595_p6 = scmp.lt.s32.totalorder %s40_s6, %s40_s6 }
  0x2b   :  { %p1591_p5 = scmp.ne.s32.totalorder %s40_s6, %s1590_s23  ;;  %p1596_p7 = scmp.lt.s32.totalorder %s1590_s23, %s1590_s23 }
  0x2d   :  { %p1597_p8 = por %p1596_p7, %p1595_p6 }
  0x2f   :  { %p1598_p9 = pnand %p1597_p8, %p1591_p5 }
  0x31   :  { %1601 = shalt.err (!%p1598_p9)
}
  0x32   :  { %45 = dma.hbm_to_vmem [thread:$0]  %s1739_s2, 1024, %s40_s6, [#allocation7], %s1631_s25, %s1631_s25, %s1632_s26  }
  0x33   :  { %1624 = dma.done.wait [#allocation4], 1280  }
  0x34   :  { %1625 = vsyncadd [#allocation4], 4294966016 }
  0x35   :  { %1626 = dma.done.wait [#allocation7], 11264  }
  0x36   :  { %1627 = vsyncadd [#allocation7], 4294956032  ;;  %vm59_vm0 = vcmask 1044320   ;;  %v1635_v0 = vmov 0   ;;  %v1430_v1 = vld [vmem:[#allocation6 + $0x40] sm:$0xff]   ;;  %v1434_v5 = vld [vmem:[#allocation6 + $0x48] sm:$0xff]  }
  0x37   :  { %60 = vst.msk [vmem:[#allocation2 + $0x24] sm:$0xf] %vm59_vm0, %v1635_v0  ;;  %v1431_v2 = vld [vmem:[#allocation6] sm:$0xff]   ;;  %1282 = vmatprep.subr.bf16.mxu0 %v1430_v1  ;;  %v1435_v6 = vld [vmem:[#allocation6 + $0x8] sm:$0xff]   ;;  %v1438_v9 = vld [vmem:[#allocation6 + $0x50] sm:$0xff]   ;;  %vm115_vm1 = vcmask 1043456  }
  0x38   :  { %v1432_v3 = vld [vmem:[#allocation6 + $0xc0] sm:$0xff]   ;;  %1283 = vmatpush3.bf16.msra.mxu0 %v1431_v2  ;;  %v1436_v7 = vld [vmem:[#allocation6 + $0xc8] sm:$0xff]   ;;  %v1439_v10 = vld [vmem:[#allocation6 + $0x10] sm:$0xff]   ;;  %vm116_vm2 = vcmask 883716   ;;  %vm1637_vm4 = vmmov 0  }
  0x39   :  { %v1433_v4 = vld [vmem:[#allocation6 + $0x80] sm:$0xff]   ;;  %1304 = vmatprep.subr.bf16.mxu1 %v1432_v3  ;;  %1284 = vmatprep.subr.bf16.mxu0 %v1434_v5  ;;  %v1437_v8 = vld [vmem:[#allocation6 + $0x88] sm:$0xff]   ;;  %v1440_v11 = vld [vmem:[#allocation6 + $0xd0] sm:$0xff]  }
  0x3a   :  { %1305 = vmatpush3.bf16.msra.mxu1 %v1433_v4  ;;  %v1441_v12 = vld [vmem:[#allocation6 + $0x90] sm:$0xff]   ;;  %v1442_v13 = vld [vmem:[#allocation6 + $0x58] sm:$0xff]   ;;  %v1446_v17 = vld [vmem:[#allocation6 + $0x60] sm:$0xff]  }
  0x3b   :  { %1306 = vmatprep.subr.bf16.mxu1 %v1436_v7  ;;  %v1443_v14 = vld [vmem:[#allocation6 + $0x18] sm:$0xff]   ;;  %v1447_v18 = vld [vmem:[#allocation6 + $0x20] sm:$0xff]   ;;  %v1450_v21 = vld [vmem:[#allocation6 + $0x68] sm:$0xff]  }
  0x3c   :  { %1285 = vmatpush3.bf16.msra.mxu0 %v1435_v6  ;;  %v1444_v15 = vld [vmem:[#allocation6 + $0xd8] sm:$0xff]   ;;  %v1448_v19 = vld [vmem:[#allocation6 + $0xe0] sm:$0xff]   ;;  %v1451_v22 = vld [vmem:[#allocation6 + $0x28] sm:$0xff]  }
  0x3d   :  { %1286 = vmatprep.subr.bf16.mxu0 %v1438_v9  ;;  %v1445_v16 = vld [vmem:[#allocation6 + $0x98] sm:$0xff]   ;;  %v1449_v20 = vld [vmem:[#allocation6 + $0xa0] sm:$0xff]   ;;  %v1452_v23 = vld [vmem:[#allocation6 + $0xe8] sm:$0xff]  }
  0x3e   :  { %1307 = vmatpush3.bf16.msra.mxu1 %v1437_v8  ;;  %v1453_v24 = vld [vmem:[#allocation6 + $0xa8] sm:$0xff]   ;;  %v1454_v25 = vld [vmem:[#allocation6 + $0x70] sm:$0xff]   ;;  %v1458_v29 = vld [vmem:[#allocation6 + $0x78] sm:$0xff]  }
  0x3f   :  { %1308 = vmatprep.subr.bf16.mxu1 %v1440_v11  ;;  %v1455_v26 = vld [vmem:[#allocation6 + $0x30] sm:$0xff]   ;;  %v1459_v30 = vld [vmem:[#allocation6 + $0x38] sm:$0xff]   ;;  %v1462_v35 = vld [vmem:[#allocation6 + $0x140] sm:$0xff]  }
  0x40   :  { %1287 = vmatpush3.bf16.msra.mxu0 %v1439_v10  ;;  %v1456_v27 = vld [vmem:[#allocation6 + $0xf0] sm:$0xff]   ;;  %v1460_v31 = vld [vmem:[#allocation6 + $0xf8] sm:$0xff]   ;;  %v63_v36 = vld [vmem:[#allocation3 + $0x10] sm:$0xff] }
  0x41   :  { %1288 = vmatprep.subr.bf16.mxu0 %v1442_v13  ;;  %v1457_v28 = vld [vmem:[#allocation6 + $0xb0] sm:$0xff]   ;;  %v62_v33 = vld [vmem:[#allocation3 + $0x8] sm:$0xff]  ;;  %v64_v39 = vld [vmem:[#allocation3 + $0x18] sm:$0xff]  ;;  %v1530_v42 = vpack.c.bf16 %v63_v36, %v63_v36 }
  0x42   :  { %1309 = vmatpush3.bf16.msra.mxu1 %v1441_v12  ;;  %v61_v32 = vld [vmem:[#allocation3] sm:$0xff]  ;;  %v1461_v34 = vld [vmem:[#allocation6 + $0xb8] sm:$0xff]   ;;  %v1529_v38 = vpack.c.bf16 %v62_v33, %v62_v33  ;;  %v1463_v40 = vld [vmem:[#allocation6 + $0x100] sm:$0xff]   ;;  %v1531_v43 = vpack.c.bf16 %v64_v39, %v64_v39  ;;  %v284_v39 = vlaneseq }
  0x43   :  { %1310 = vmatprep.subr.bf16.mxu1 %v1444_v15  ;;  %v1528_v37 = vpack.c.bf16 %v61_v32, %v61_v32  ;;  %v1464_v41 = vld [vmem:[#allocation6 + $0x1c0] sm:$0xff]   ;;  %v1466_v45 = vld [vmem:[#allocation6 + $0x148] sm:$0xff]   ;;  %v1470_v49 = vld [vmem:[#allocation6 + $0x150] sm:$0xff]  }
  0x44   :  { %1289 = vmatpush3.bf16.msra.mxu0 %v1443_v14  ;;  %835 = vmatprep.mubr.bf16.mxu0 %v1529_v38  ;;  %v1465_v44 = vld [vmem:[#allocation6 + $0x180] sm:$0xff]   ;;  %v1467_v46 = vld [vmem:[#allocation6 + $0x108] sm:$0xff]   ;;  %v1471_v50 = vld [vmem:[#allocation6 + $0x110] sm:$0xff]  }
  0x45   :  { %1290 = vmatprep.subr.bf16.mxu0 %v1446_v17  ;;  %875 = vmatprep.mubr.bf16.mxu1 %v1531_v43  ;;  %v1468_v47 = vld [vmem:[#allocation6 + $0x1c8] sm:$0xff]   ;;  %v1472_v51 = vld [vmem:[#allocation6 + $0x1d0] sm:$0xff]   ;;  %v1474_v53 = vld [vmem:[#allocation6 + $0x158] sm:$0xff]  }
  0x46   :  { %1311 = vmatpush3.bf16.msra.mxu1 %v1445_v16  ;;  %v1469_v48 = vld [vmem:[#allocation6 + $0x188] sm:$0xff]   ;;  %v1473_v52 = vld [vmem:[#allocation6 + $0x190] sm:$0xff]   ;;  %v1475_v54 = vld [vmem:[#allocation6 + $0x118] sm:$0xff]  }
  0x47   :  { %1312 = vmatprep.subr.bf16.mxu1 %v1448_v19  ;;  %v1476_v55 = vld [vmem:[#allocation6 + $0x1d8] sm:$0xff]   ;;  %v1478_v57 = vld [vmem:[#allocation6 + $0x160] sm:$0xff]   ;;  %v1482_v61 = vld [vmem:[#allocation6 + $0x168] sm:$0xff]  }
  0x48   :  { %1291 = vmatpush3.bf16.msra.mxu0 %v1447_v18  ;;  %v1477_v56 = vld [vmem:[#allocation6 + $0x198] sm:$0xff]   ;;  %v1479_v58 = vld [vmem:[#allocation6 + $0x120] sm:$0xff]   ;;  %v1483_v62 = vld [vmem:[#allocation6 + $0x128] sm:$0xff]  }
  0x49   :  { %1292 = vmatprep.subr.bf16.mxu0 %v1450_v21  ;;  %v1480_v59 = vld [vmem:[#allocation6 + $0x1e0] sm:$0xff]   ;;  %v1484_v63 = vld [vmem:[#allocation6 + $0x1e8] sm:$0xff]   ;;  %v1486_v1 = vld [vmem:[#allocation6 + $0x170] sm:$0xff]  }
  0x4a   :  { %1313 = vmatpush3.bf16.msra.mxu1 %v1449_v20  ;;  %v1481_v60 = vld [vmem:[#allocation6 + $0x1a0] sm:$0xff]   ;;  %v1485_v0 = vld [vmem:[#allocation6 + $0x1a8] sm:$0xff]   ;;  %v1487_v2 = vld [vmem:[#allocation6 + $0x130] sm:$0xff]  }
  0x4b   :  { %1314 = vmatprep.subr.bf16.mxu1 %v1452_v23  ;;  %v1488_v3 = vld [vmem:[#allocation6 + $0x1f0] sm:$0xff]   ;;  %v1490_v5 = vld [vmem:[#allocation6 + $0x178] sm:$0xff]   ;;  %v1494_v11 = vld [vmem:[#allocation6 + $0x240] sm:$0xff]  }
  0x4c   :  { %1293 = vmatpush3.bf16.msra.mxu0 %v1451_v22  ;;  %v1489_v4 = vld [vmem:[#allocation6 + $0x1b0] sm:$0xff]   ;;  %v1491_v6 = vld [vmem:[#allocation6 + $0x138] sm:$0xff]   ;;  %v67_v14 = vld [vmem:[#allocation3 + $0x30] sm:$0xff] }
  0x4d   :  { %1294 = vmatprep.subr.bf16.mxu0 %v1454_v25  ;;  %v1492_v7 = vld [vmem:[#allocation6 + $0x1f8] sm:$0xff]   ;;  %v65_v8 = vld [vmem:[#allocation3 + $0x20] sm:$0xff]  ;;  %v68_v15 = vld [vmem:[#allocation3 + $0x38] sm:$0xff]  ;;  %v1534_v18 = vpack.c.bf16 %v67_v14, %v67_v14 }
  0x4e   :  { %1315 = vmatpush3.bf16.msra.mxu1 %v1453_v24  ;;  %v66_v9 = vld [vmem:[#allocation3 + $0x28] sm:$0xff]  ;;  %v1532_v12 = vpack.c.bf16 %v65_v8, %v65_v8  ;;  %v1495_v16 = vld [vmem:[#allocation6 + $0x200] sm:$0xff]   ;;  %v1496_v17 = vld [vmem:[#allocation6 + $0x248] sm:$0xff]   ;;  %v1535_v19 = vpack.c.bf16 %v68_v15, %v68_v15  ;;  %v1636_v15 = vmov 0.0  }
  0x4f   :  { %1316 = vmatprep.subr.bf16.mxu1 %v1456_v27  ;;  %v1493_v10 = vld [vmem:[#allocation6 + $0x1b8] sm:$0xff]   ;;  %v1533_v13 = vpack.c.bf16 %v66_v9, %v66_v9  ;;  %v1497_v20 = vld [vmem:[#allocation6 + $0x208] sm:$0xff]   ;;  %v1498_v21 = vld [vmem:[#allocation6 + $0x250] sm:$0xff]  }
  0x50   :  { %1295 = vmatpush3.bf16.msra.mxu0 %v1455_v26  ;;  %v1499_v22 = vld [vmem:[#allocation6 + $0x210] sm:$0xff]   ;;  %v1500_v23 = vld [vmem:[#allocation6 + $0x258] sm:$0xff]   ;;  %vm117_vm3 = vmor %vm116_vm2, %vm115_vm1 }
  0x51   :  { %1296 = vmatprep.subr.bf16.mxu0 %v1458_v29  ;;  %v1501_v24 = vld [vmem:[#allocation6 + $0x218] sm:$0xff]   ;;  %v1502_v25 = vld [vmem:[#allocation6 + $0x260] sm:$0xff]   ;;  %v1504_v27 = vld [vmem:[#allocation6 + $0x268] sm:$0xff]  }
  0x52   :  { %1317 = vmatpush3.bf16.msra.mxu1 %v1457_v28  ;;  %v1503_v26 = vld [vmem:[#allocation6 + $0x220] sm:$0xff]   ;;  %v69_v28 = vld [vmem:[#allocation3 + $0x40] sm:$0xff]  ;;  %v70_v29 = vld [vmem:[#allocation3 + $0x48] sm:$0xff] }
  0x53   :  { %1318 = vmatprep.subr.bf16.mxu1 %v1460_v31  ;;  %v1505_v31 = vld [vmem:[#allocation6 + $0x228] sm:$0xff]   ;;  %v1506_v32 = vld [vmem:[#allocation6 + $0x270] sm:$0xff]   ;;  %v1512_v14 = vld [vmem:[#allocation8] sm:$0xff]  }
  0x54   :  { %1297 = vmatpush3.bf16.msra.mxu0 %v1459_v30  ;;  %v1281_v30 = vpack.c.bf16 %v70_v29, %v69_v28  ;;  %v1507_v33 = vld [vmem:[#allocation6 + $0x230] sm:$0xff]  }
  0x55   :  { %1326 = vmatprep.subr.bf16.mxu0 %v1462_v35 }
  0x56   :  { %1319 = vmatpush3.bf16.msra.mxu1 %v1461_v34  ;;  %118 = vst.msk [vmem:[#allocation2 + $0x20] sm:$0xff] %vm117_vm3, %v1281_v30  ;;  %v1508_v34 = vld [vmem:[#allocation6 + $0x278] sm:$0xff]  }
  0x57   :  { %836 = vmatmul.mubr.bf16.vlgmr.msra.gmra.mrb[0].mxu0 %v1528_v37  ;;  %1348 = vmatprep.subr.bf16.mxu1 %v1464_v41  ;;  %v1509_v37 = vld [vmem:[#allocation6 + $0x238] sm:$0xff]  }
  0x58   :  { %1327 = vmatpush3.bf16.msra.mxu0 %v1463_v40  ;;  %915 = vmatprep.mubr.bf16.mxu0 %v1533_v13  ;;  %v1706_v40 = vshrl.u32 %v284_v39, 7 }
  0x59   :  { %876 = vmatmul.mubr.bf16.vlgmr.msra.gmra.mrb[0].mxu1 %v1530_v42  ;;  %1328 = vmatprep.subr.bf16.mxu0 %v1466_v45  ;;  %v1712_v42 = vld [vmem:[%s1740_s3] sm:$0xff]  ;;  %s1638_s3 = smov [#allocation9]  }
  0x5a   :  { %1349 = vmatpush3.bf16.msra.mxu1 %v1465_v44  ;;  %955 = vmatprep.mubr.bf16.mxu1 %v1535_v19  ;;  %v286_v41 = vsub.s32 0, %v1706_v40  ;;  %v1516_v19 = vld [vmem:[#allocation8 + $0x20] sm:$0xff]   ;;  %s1164_s26 = sshll.u32 %s1638_s3, 4  ;;  %s1165_s26 = int_to_ptr.vmem [resolvable:$true] %s1164_s26 }
  0x5b   :  { %1350 = vmatprep.subr.bf16.mxu1 %v1468_v47  ;;  %s1602_s27 = scalar_lea.vmem %s1165_s26, 128  ;;  %p1607_p11 = scmp.lt.s32.totalorder %s1165_s26, %s1165_s26 }
  0x5c   :  { %1329 = vmatpush3.bf16.msra.mxu0 %v1467_v46  ;;  %v287_v44 = vrot.slane %v1712_v42, %v286_v41  ;;  %p1603_p10 = scmp.ne.s32.totalorder %s1165_s26, %s1602_s27  ;;  %p1608_p12 = scmp.lt.s32.totalorder %s1602_s27, %s1602_s27 }
  0x5d   :  { %1330 = vmatprep.subr.bf16.mxu0 %v1470_v49  ;;  %v123_v35 = vld [vmem:[#allocation2 + $0x20] sm:$0xff] }
  0x5e   :  { %1351 = vmatpush3.bf16.msra.mxu1 %v1469_v48  ;;  %v1188_v36 = vcombine.high %v123_v35, %v123_v35  ;;  %v1187_v38 = vcombine.low %v123_v35, %v123_v35  ;;  %p1609_p13 = por %p1608_p12, %p1607_p11 }
  0x5f   :  { %1352 = vmatprep.subr.bf16.mxu1 %v1472_v51 }
  0x60   :  { %1331 = vmatpush3.bf16.msra.mxu0 %v1471_v50  ;;  %p1610_p0 = pnand %p1609_p13, %p1603_p10 }
  0x61   :  { %1332 = vmatprep.subr.bf16.mxu0 %v1474_v53 }
  0x62   :  { %1353 = vmatpush3.bf16.msra.mxu1 %v1473_v52 }
  0x63   :  { %1354 = vmatprep.subr.bf16.mxu1 %v1476_v55 }
  0x64   :  { %1333 = vmatpush3.bf16.msra.mxu0 %v1475_v54 }
  0x65   :  { %1334 = vmatprep.subr.bf16.mxu0 %v1478_v57 }
  0x66   :  { %1355 = vmatpush3.bf16.msra.mxu1 %v1477_v56 }
  0x67   :  { %1356 = vmatprep.subr.bf16.mxu1 %v1480_v59 }
  0x68   :  { %1335 = vmatpush3.bf16.msra.mxu0 %v1479_v58 }
  0x69   :  { %1336 = vmatprep.subr.bf16.mxu0 %v1482_v61 }
  0x6a   :  { %1357 = vmatpush3.bf16.msra.mxu1 %v1481_v60 }
  0x6b   :  { %1358 = vmatprep.subr.bf16.mxu1 %v1484_v63 }
  0x6c   :  { %1337 = vmatpush3.bf16.msra.mxu0 %v1483_v62 }
  0x6d   :  { %1338 = vmatprep.subr.bf16.mxu0 %v1486_v1 }
  0x6e   :  { %1359 = vmatpush3.bf16.msra.mxu1 %v1485_v0 }
  0x6f   :  { %1360 = vmatprep.subr.bf16.mxu1 %v1488_v3 }
  0x70   :  { %1339 = vmatpush3.bf16.msra.mxu0 %v1487_v2 }
  0x71   :  { %1340 = vmatprep.subr.bf16.mxu0 %v1490_v5 }
  0x72   :  { %1361 = vmatpush3.bf16.msra.mxu1 %v1489_v4 }
  0x73   :  { %1362 = vmatprep.subr.bf16.mxu1 %v1492_v7 }
  0x74   :  { %1341 = vmatpush3.bf16.msra.mxu0 %v1491_v6 }
  0x75   :  { %1370 = vmatprep.subr.bf16.mxu0 %v1494_v11 }
  0x76   :  { %1363 = vmatpush3.bf16.msra.mxu1 %v1493_v10 }
  0x77   :  { %916 = vmatmul.mubr.bf16.vlgmr.msra.gmra.mrb[4].mxu0 %v1532_v12  ;;  %1401 = vmatprep.subr.bf16.mxu1 %v1636_v15 }
  0x78   :  { %1371 = vmatpush3.bf16.msra.mxu0 %v1495_v16  ;;  %995 = vmatprep.mubr.bf16.mxu0 %v1188_v36  ;;  %v1513_v16 = vld [vmem:[#allocation8 + $0x8] sm:$0xff]   ;;  %v1045_v36 = vsub.s32 3, %v1706_v40 }
  0x79   :  { %1372 = vmatprep.subr.bf16.mxu0 %v1496_v17  ;;  %956 = vmatmul.mubr.bf16.vlgmr.msra.gmra.mrb[4].mxu1 %v1534_v18  ;;  %v1514_v17 = vld [vmem:[#allocation8 + $0x10] sm:$0xff]   ;;  %v1515_v18 = vld [vmem:[#allocation8 + $0x18] sm:$0xff]  }
  0x7a   :  { %1402 = vmatpush3.bf16.msra.mxu1 %v1512_v14  ;;  %1417 = vmatprep.mubr.msk.bf16.mxu1 %vm1637_vm4, %v1636_v15 }
  0x7b   :  { %1403 = vmatprep.subr.bf16.mxu1 %v1636_v15 }
  0x7c   :  { %1373 = vmatpush3.bf16.msra.mxu0 %v1497_v20  ;;  %v1517_v20 = vld [vmem:[#allocation8 + $0x28] sm:$0xff]  }
  0x7d   :  { %1374 = vmatprep.subr.bf16.mxu0 %v1498_v21  ;;  %v1518_v21 = vld [vmem:[#allocation8 + $0x30] sm:$0xff]  }
  0x7e   :  { %1404 = vmatpush3.bf16.msra.mxu1 %v1513_v16 }
  0x7f   :  { %1405 = vmatprep.subr.bf16.mxu1 %v1636_v15 }
  0x80   :  { %1375 = vmatpush3.bf16.msra.mxu0 %v1499_v22  ;;  %v1519_v22 = vld [vmem:[#allocation8 + $0x38] sm:$0xff]  }
  0x81   :  { %1376 = vmatprep.subr.bf16.mxu0 %v1500_v23 }
  0x82   :  { %1406 = vmatpush3.bf16.msra.mxu1 %v1514_v17 }
  0x83   :  { %1407 = vmatprep.subr.bf16.mxu1 %v1636_v15 }
  0x84   :  { %1377 = vmatpush3.bf16.msra.mxu0 %v1501_v24 }
  0x85   :  { %1378 = vmatprep.subr.bf16.mxu0 %v1502_v25 }
  0x86   :  { %1408 = vmatpush3.bf16.msra.mxu1 %v1515_v18 }
  0x87   :  { %1409 = vmatprep.subr.bf16.mxu1 %v1636_v15 }
  0x88   :  { %1379 = vmatpush3.bf16.msra.mxu0 %v1503_v26  ;;  %v1017_v26 = vsub.s32 1, %v1706_v40 }
  0x89   :  { %1380 = vmatprep.subr.bf16.mxu0 %v1504_v27  ;;  %v1022_v27 = vsub.s32 2, %v1706_v40 }
  0x8a   :  { %1410 = vmatpush3.bf16.msra.mxu1 %v1516_v19  ;;  %v1018_v28 = vrot.slane %v1712_v42, %v1017_v26 }
  0x8b   :  { %1411 = vmatprep.subr.bf16.mxu1 %v1636_v15 }
  0x8c   :  { %1381 = vmatpush3.bf16.msra.mxu0 %v1505_v31  ;;  %v1023_v31 = vrot.slane %v1712_v42, %v1022_v27 }
  0x8d   :  { %1382 = vmatprep.subr.bf16.mxu0 %v1506_v32 }
  0x8e   :  { %1412 = vmatpush3.bf16.msra.mxu1 %v1517_v20 }
  0x8f   :  { %1413 = vmatprep.subr.bf16.mxu1 %v1636_v15 }
  0x90   :  { %1383 = vmatpush3.bf16.msra.mxu0 %v1507_v33 }
  0x91   :  { %1384 = vmatprep.subr.bf16.mxu0 %v1508_v34 }
  0x92   :  { %1414 = vmatpush3.bf16.msra.mxu1 %v1518_v21 }
  0x93   :  { %1415 = vmatprep.subr.bf16.mxu1 %v1636_v15 }
  0x94   :  { %1385 = vmatpush3.bf16.msra.mxu0 %v1509_v37  ;;  %v1046_v37 = vrot.slane %v1712_v42, %v1045_v36 }
  0x96   :  { %1416 = vmatpush3.bf16.msra.mxu1 %v1519_v22 }
  0x97   :  { %996 = vmatmul.mubr.bf16.vlgmr.msra.gmra.mrb[8].mxu0 %v1187_v38 }
 0x12a   :  { %v1298_v43 = vpop.f32.mrb[0].mxu0 }
 0x12b   :  { %v1299_v45 = vpop.f32.mrb[1].mxu0 }
 0x12c   :  { %v1300_v46 = vadd.f32 %v1299_v45, %v1298_v43  ;;  %v1301_v47 = vpop.f32.mrb[2].mxu0  ;;  %v1320_v48 = vpop.f32.mrb[0].mxu1 }
 0x12d   :  { %v1302_v49 = vpop.f32.mrb[3].mxu0  ;;  %v1321_v51 = vpop.f32.mrb[1].mxu1 }
 0x12e   :  { %v838_v50 = vadd.f32 %v1300_v46, %v287_v44  ;;  %v1322_v52 = vadd.f32 %v1321_v51, %v1320_v48  ;;  %v1323_v53 = vpop.f32.mrb[2].mxu1 }
 0x12f   :  { %v1324_v54 = vpop.f32.mrb[3].mxu1  ;;  %v1153_v53 = vsub.s32 5, %v1706_v40 }
 0x130   :  { %v878_v55 = vadd.f32 %v1322_v52, %v838_v50  ;;  %v1148_v52 = vsub.s32 4, %v1706_v40 }
 0x132   :  { %v1149_v54 = vrot.slane %v1712_v42, %v1148_v52 }
 0x14a   :  { %v1342_v56 = vpop.f32.mrb[4].mxu0 }
 0x14b   :  { %v1343_v57 = vpop.f32.mrb[5].mxu0 }
 0x14c   :  { %v1344_v58 = vadd.f32 %v1343_v57, %v1342_v56  ;;  %v1345_v59 = vpop.f32.mrb[6].mxu0  ;;  %v1364_v60 = vpop.f32.mrb[4].mxu1  ;;  %v1154_v57 = vrot.slane %v1712_v42, %v1153_v53 }
 0x14d   :  { %v1346_v61 = vpop.f32.mrb[7].mxu0  ;;  %v1365_v63 = vpop.f32.mrb[5].mxu1 }
 0x14e   :  { %v918_v62 = vadd.f32 %v1344_v58, %v878_v55  ;;  %v1366_v0 = vadd.f32 %v1365_v63, %v1364_v60  ;;  %v1367_v1 = vpop.f32.mrb[6].mxu1 }
 0x14f   :  { %v1368_v2 = vpop.f32.mrb[7].mxu1 }
 0x150   :  { %v958_v3 = vadd.f32 %v1366_v0, %v918_v62 }
 0x16a   :  { %v1386_v4 = vpop.f32.mrb[8].mxu0 }
 0x16b   :  { %v1387_v5 = vpop.f32.mrb[9].mxu0 }
 0x16c   :  { %v1388_v6 = vadd.f32 %v1387_v5, %v1386_v4  ;;  %v1389_v7 = vpop.f32.mrb[10].mxu0 }
 0x16d   :  { %v1390_v8 = vpop.f32.mrb[11].mxu0 }
 0x16e   :  { %v998_v9 = vadd.f32 %v1388_v6, %v958_v3 }
 0x170   :  { %1003 = vadd.xlane.f32.xlu0 %v998_v9 }
 0x1fd   :  { %v1004_v10 = vpop.xlane.xlu0 %1003 }
 0x1fe   :  { %v1006_v11 = vmul.f32 0.0078125, %v1004_v10 }
 0x200   :  { %v1007_v12 = vsub.f32 %v998_v9, %v1006_v11 }
 0x202   :  { %v1008_v13 = vmul.f32 %v1007_v12, %v1007_v12 }
 0x204   :  { %1009 = vadd.xlane.f32.xlu0 %v1008_v13 }
 0x291   :  { %v1010_v23 = vpop.xlane.xlu0 %1009 }
 0x292   :  { %v1011_v24 = vmul.f32 0.0078125, %v1010_v23 }
 0x294   :  { %v1012_v25 = vadd.f32 1e-05, %v1011_v24 }
 0x296   :  { %1520 = vrsqrt.f32 %v1012_v25 }
 0x2a0   :  { %v1521_v29 = vpop.eup %1520 }
 0x2a1   :  { %v1014_v30 = vmul.f32 %v1521_v29, %v1007_v12 }
 0x2a3   :  { %v1019_v32 = vmul.f32 %v1018_v28, %v1014_v30 }
 0x2a5   :  { %v1024_v33 = vadd.f32 %v1023_v31, %v1019_v32 }
 0x2a7   :  { %1522 = vtanh.f32 %v1024_v33 }
 0x2b1   :  { %v1523_v34 = vpop.eup %1522 }
 0x2b2   :  { %v1026_v35 = vpack.c.bf16 %v1523_v34, %v1523_v34 }
 0x2b4   :  { %1418 = vmatmul.mubr.bf16.vlgmr.msra.gmra.mrb[8].mxu1 %v1026_v35 }
 0x387   :  { %v1129_v38 = vpop.f32.mrb[8].mxu1 }
 0x388   :  { %v1130_v39 = vadd.f32 %v1129_v38, %v1046_v37  ;;  %v1419_v41 = vpop.f32.mrb[9].mxu1 }
 0x389   :  { %v1132_v43 = vpop.f32.mrb[10].mxu1 }
 0x38a   :  { %1135 = vadd.xlane.f32.xlu1 %v1130_v39  ;;  %v1420_v44 = vpop.f32.mrb[11].mxu1 }
 0x417   :  { %v1136_v45 = vpop.xlane.xlu1 %1135 }
 0x418   :  { %v1137_v46 = vmul.f32 0.0078125, %v1136_v45 }
 0x41a   :  { %v1138_v47 = vsub.f32 %v1130_v39, %v1137_v46 }
 0x41c   :  { %v1139_v48 = vmul.f32 %v1138_v47, %v1138_v47 }
 0x41e   :  { %1140 = vadd.xlane.f32.xlu1 %v1139_v48 }
 0x4ab   :  { %v1141_v49 = vpop.xlane.xlu1 %1140 }
 0x4ac   :  { %v1142_v50 = vmul.f32 0.0078125, %v1141_v49 }
 0x4ae   :  { %v1143_v51 = vadd.f32 1e-05, %v1142_v50 }
 0x4b0   :  { %1524 = vrsqrt.f32 %v1143_v51 }
 0x4ba   :  { %v1525_v55 = vpop.eup %1524 }
 0x4bb   :  { %v1145_v56 = vmul.f32 %v1525_v55, %v1138_v47 }
 0x4bd   :  { %v1150_v58 = vmul.f32 %v1149_v54, %v1145_v56 }
 0x4bf   :  { %v1155_v59 = vadd.f32 %v1154_v57, %v1150_v58 }
 0x4c1   :  { %1526 = vtanh.f32 %v1155_v59 }
 0x4cb   :  { %v1527_v60 = vpop.eup %1526 }
 0x4cc   :  { %1157 = vst [vmem:[#allocation9] sm:$0xff] %v1527_v60 }
 0x4cd   :  { %1613 = shalt.err (!%p1610_p0)
}
 0x4ce   :  { %s1614_s30 = scalar_lea.hbm %s1741_s4, 128 }
 0x4cf   :  { %p1615_p1 = scmp.ne.s32.totalorder %s1741_s4, %s1614_s30  ;;  %p1618_p2 = scmp.lt.u32.totalorder %s1614_s30, %s1741_s4 }
 0x4d1   :  { %p1620_p3 = pnand %p1618_p2, %p1615_p1 }
 0x4d3   :  { %1623 = shalt.err (!%p1620_p3)
}
 0x4d4   :  { %1167 = dma.vmem_to_hbm [thread:$0]  %s1165_s26, 128, %s1741_s4, [#allocation5]  }
 0x4d5   :  { %1628 = dma.done.wait [#allocation5], 128  }
 0x4d6   :  { %1629 = vsyncadd [#allocation5], 4294967168 }
 0x4d7   :  { %1171 = vsyncpa [#allocation4], 1 }
 0x4d8   :  { %1172 = vsyncpa [#allocation7], 1 }
 0x4d9   :  { %1173 = vsyncpa [#allocation5], 1 }

</bundles_post_ra>
